<compile_context>
chip_gen: v6e
topology: v6e:2x2x1
jax: 0.10.0
libtpu: 0.0.40
codegen_flags: <defaults>
</compile_context>

<pallas_src>
import functools
import math

import jax
import jax.numpy as jnp
from jax.experimental import pallas as pl
from jax.experimental.pallas import tpu as pltpu


_VMEM_LIMIT = 32 * 1024 * 1024  # safe scoped-VMEM request on v5e / v6e / v7x


# ---------------- tiling helpers ----------------

def _pick_tile(dim, target, align):
    """Largest `align`-multiple divisor of `dim` that is <= target.

    If the whole dim fits under `target`, use the full dim (always legal for a
    BlockSpec). Falls back to the full dim if no aligned divisor exists.
    """
    if dim <= target:
        return dim
    t = (target // align) * align
    while t >= align:
        if dim % t == 0:
            return t
        t -= align
    return dim


def _pick_head_group(bh, tq, tkv, budget_bytes=128 * 1024):
    """Largest divisor of `bh` keeping the f32 score tile (G, tq, tkv) <= budget."""
    gmax = max(1, budget_bytes // (tq * tkv * 4))
    g = 1
    for cand in range(1, bh + 1):
        if bh % cand == 0 and cand <= gmax:
            g = cand
    return g


# ---------------- fused single-pass Q/K/V projection ----------------

def _qkv_proj_kernel(x_ref, w_ref, o_ref):
    # Full contraction dim resident in VMEM -> single MXU pass, no accumulator.
    o_ref[0] = jnp.dot(
        x_ref[...], w_ref[0], preferred_element_type=jnp.float32
    ).astype(o_ref.dtype)


def qkv_projection(x, w_qkv_t, *, tm=512):
    """x: (M, E) @ w_qkv_t: (3, E, H) -> (3, M, H). x is DMA'd from HBM once."""
    M, E = x.shape
    three, E2, H = w_qkv_t.shape
    assert three == 3 and E2 == E, (x.shape, w_qkv_t.shape)
    tm = _pick_tile(M, tm, 16)          # 16-aligned sublanes for bf16 packing
    grid = (M // tm, 3)                  # j (q/k/v) innermost: x tile stays resident

    cost = pl.CostEstimate(
        flops=2 * M * E * 3 * H,
        transcendentals=0,
        bytes_accessed=(M * E + 3 * E * H * (M // tm) + 3 * M * H)
        * x.dtype.itemsize,
    )
    return pl.pallas_call(
        _qkv_proj_kernel,
        out_shape=jax.ShapeDtypeStruct((3, M, H), x.dtype),
        grid=grid,
        in_specs=[
            pl.BlockSpec((tm, E), lambda i, j: (i, 0)),
            pl.BlockSpec((1, E, H), lambda i, j: (j, 0, 0)),
        ],
        out_specs=pl.BlockSpec((1, tm, H), lambda i, j: (j, i, 0)),
        compiler_params=pltpu.CompilerParams(
            dimension_semantics=("parallel", "arbitrary"),
            vmem_limit_bytes=_VMEM_LIMIT,
        ),
        cost_estimate=cost,
    )(x, w_qkv_t)


# ---------------- single-pass output projection ----------------

def _matmul_kernel(x_ref, w_ref, o_ref):
    o_ref[...] = jnp.dot(
        x_ref[...], w_ref[...], preferred_element_type=jnp.float32
    ).astype(o_ref.dtype)


def matmul(x, w, *, out_dtype=None, tm=512, tn=512):
    """(M, K) @ (K, N): single K pass, weight tile resident across the inner M loop."""
    M, K = x.shape
    K2, N = w.shape
    assert K == K2, (x.shape, w.shape)
    out_dtype = out_dtype or x.dtype
    tm = _pick_tile(M, tm, 16)
    tn = _pick_tile(N, tn, 128)
    grid = (N // tn, M // tm)            # i (M) innermost -> weight not re-fetched per i

    cost = pl.CostEstimate(
        flops=2 * M * N * K,
        transcendentals=0,
        bytes_accessed=(M * K * (N // tn) + K * N) * x.dtype.itemsize
        + M * N * jnp.dtype(out_dtype).itemsize,
    )
    return pl.pallas_call(
        _matmul_kernel,
        out_shape=jax.ShapeDtypeStruct((M, N), out_dtype),
        grid=grid,
        in_specs=[
            pl.BlockSpec((tm, K), lambda j, i: (i, 0)),
            pl.BlockSpec((K, tn), lambda j, i: (0, j)),
        ],
        out_specs=pl.BlockSpec((tm, tn), lambda j, i: (i, j)),
        compiler_params=pltpu.CompilerParams(
            dimension_semantics=("parallel", "parallel"),
            vmem_limit_bytes=_VMEM_LIMIT,
        ),
        cost_estimate=cost,
    )(x, w)


# ---------------- flash-style causal attention ----------------

def _flash_attn_kernel(q_ref, k_ref, v_ref, o_ref, m_sc, l_sc, acc_sc, *,
                       tq, tkv, causal):
    qi = pl.program_id(1)
    ki = pl.program_id(2)

    @pl.when(ki == 0)
    def _init():
        m_sc[...] = jnp.full_like(m_sc, -jnp.inf)
        l_sc[...] = jnp.zeros_like(l_sc)
        acc_sc[...] = jnp.zeros_like(acc_sc)

    def _update(apply_mask):
        q = q_ref[0]          # (G, tq, D); 1/sqrt(D) already folded into the q weights
        k = k_ref[0]          # (G, tkv, D)
        v = v_ref[0]
        # MXU matmuls with bf16 operands, f32 accumulation.
        s = jax.lax.dot_general(
            q, k, (((2,), (2,)), ((0,), (0,))),
            preferred_element_type=jnp.float32)              # (G, tq, tkv)
        if apply_mask:
            q_idx = qi * tq + jax.lax.broadcasted_iota(jnp.int32, s.shape, 1)
            k_idx = ki * tkv + jax.lax.broadcasted_iota(jnp.int32, s.shape, 2)
            s = jnp.where(k_idx <= q_idx, s, -1e30)   # big finite negative: no NaN risk
        m_prev = m_sc[...]
        m_new = jnp.maximum(m_prev, jnp.max(s, axis=-1, keepdims=True))
        alpha = jnp.exp(m_prev - m_new)
        p = jnp.exp(s - m_new)
        l_sc[...] = alpha * l_sc[...] + jnp.sum(p, axis=-1, keepdims=True)
        acc_sc[...] = alpha * acc_sc[...] + jax.lax.dot_general(
            p.astype(v.dtype), v, (((2,), (1,)), ((0,), (0,))),
            preferred_element_type=jnp.float32)              # (G, tq, D)
        m_sc[...] = m_new

    if causal:
        # Tile classification against the causal diagonal:
        #   fully above  -> skip entirely (and its K/V DMA is clamped away in index_map)
        #   intersecting -> masked update
        #   fully below  -> unmasked update (no per-element mask cost)
        has_unmasked = ki * tkv <= qi * tq + (tq - 1)
        has_masked = ki * tkv + (tkv - 1) > qi * tq
        pl.when(jnp.logical_and(has_unmasked, has_masked))(
            functools.partial(_update, True))
        pl.when(jnp.logical_and(has_unmasked, jnp.logical_not(has_masked)))(
            functools.partial(_update, False))
    else:
        _update(False)

    @pl.when(ki == pl.num_programs(2) - 1)
    def _finalize():
        # Exact normalization (once per q tile; negligible cost, tight accuracy).
        o_ref[...] = (acc_sc[...] / l_sc[...]).astype(o_ref.dtype)


def flash_attention(qkv, *, causal=True, tq=256, tkv=128):
    """qkv: (3, B*H, N, D) fused projections -> (B*H, N, D) SDPA output."""
    three, BH, N, D = qkv.shape
    assert three == 3
    tq = _pick_tile(N, tq, 16)
    tkv = _pick_tile(N, tkv, 16)
    G = _pick_head_group(BH, tq, tkv)       # amortize per-grid-step overhead
    grid = (BH // G, N // tq, N // tkv)

    def q_map(g, qi, ki):
        return (0, g, qi, 0)

    def kv_map(j):
        def index(g, qi, ki):
            if causal:
                # Clamp above-diagonal steps to the diagonal block: same block index
                # as the previous step -> Pallas issues no new K/V DMA for them.
                ki_eff = jnp.minimum(ki, (qi * tq + tq - 1) // tkv)
            else:
                ki_eff = ki
            return (j, g, ki_eff, 0)
        return index

    kernel = functools.partial(_flash_attn_kernel, tq=tq, tkv=tkv, causal=causal)

    kv_passes = max(1, N // tq)
    flops = 4 * BH * N * N * D
    transc = BH * N * N
    if causal:
        flops //= 2
        transc //= 2
        kv_passes = max(1, kv_passes // 2)
    cost = pl.CostEstimate(
        flops=flops,
        transcendentals=transc,
        bytes_accessed=BH * N * D * qkv.dtype.itemsize * (2 + 2 * kv_passes),
    )

    return pl.pallas_call(
        kernel,
        out_shape=jax.ShapeDtypeStruct((BH, N, D), qkv.dtype),
        grid=grid,
        in_specs=[
            pl.BlockSpec((1, G, tq, D), q_map),
            pl.BlockSpec((1, G, tkv, D), kv_map(1)),
            pl.BlockSpec((1, G, tkv, D), kv_map(2)),
        ],
        out_specs=pl.BlockSpec((G, tq, D), lambda g, qi, ki: (g, qi, 0)),
        scratch_shapes=[
            pltpu.VMEM((G, tq, 1), jnp.float32),   # m (running max)
            pltpu.VMEM((G, tq, 1), jnp.float32),   # l (running denom)
            pltpu.VMEM((G, tq, D), jnp.float32),   # acc (unnormalized output)
        ],
        compiler_params=pltpu.CompilerParams(
            dimension_semantics=("parallel", "parallel", "arbitrary"),
            vmem_limit_bytes=_VMEM_LIMIT,
        ),
        cost_estimate=cost,
    )(qkv, qkv, qkv)    # same array three times; per-input specs pick slice 0/1/2


# ---------------- Module wrapper ----------------

class MultiHeadSelfAttentionPallas:
    def __init__(self, embed_dim, num_heads=4, dropout=0.1, batch_first=True,
                 key=None, compute_dtype=jnp.bfloat16):
        assert embed_dim % num_heads == 0
        self.embed_dim = embed_dim
        self.batch_first = batch_first
        self.heads = num_heads
        self.dim_head = embed_dim // num_heads
        self.scale = self.dim_head ** (-0.5)
        self.compute_dtype = compute_dtype
        self.dropout_p = dropout  # inference: identity
        hidden_dim = self.dim_head * num_heads

        if key is None:
            key = jax.random.PRNGKey(0)
        k1, k2 = jax.random.split(key)
        b_qkv = 1.0 / math.sqrt(embed_dim)
        b_out = 1.0 / math.sqrt(hidden_dim)
        # torch nn.Linear weight layout is (out_features, in_features)
        w_qkv = jax.random.uniform(k1, (hidden_dim * 3, embed_dim), jnp.float32,
                                   -b_qkv, b_qkv)
        w_out = jax.random.uniform(k2, (embed_dim, hidden_dim), jnp.float32,
                                   -b_out, b_out)

        hd = hidden_dim
        # Pre-transposed, fused, (3, E, hidden)-stacked QKV weight. The softmax
        # scale 1/sqrt(dim_head) is folded into the q slice once (in f32, before
        # the bf16 cast) so the kernel never rescales q or the scores.
        wq = jnp.transpose(w_qkv[0 * hd:1 * hd]) * self.scale
        wk = jnp.transpose(w_qkv[1 * hd:2 * hd])
        wv = jnp.transpose(w_qkv[2 * hd:3 * hd])
        self.w_qkv_t = jnp.stack([wq, wk, wv], axis=0).astype(compute_dtype)
        self.w_out_t = jnp.transpose(w_out).astype(compute_dtype)   # (hidden, E)

    def __call__(self, x, is_causal=True):
        if not self.batch_first:
            x = jnp.swapaxes(x, 0, 1)
        b, n, e = x.shape
        h, d = self.heads, self.dim_head

        # bf16 operands for every MXU matmul (f32 accumulation inside the kernels).
        xc = x.astype(self.compute_dtype).reshape(b * n, e)

        # Fused single-pass Q/K/V projection: x is read from HBM once.
        qkv = qkv_projection(xc, self.w_qkv_t)             # (3, b*n, h*d)

        # Reproduce torch's `.contiguous().view(b, heads, n, dim_head)` RAW reshape
        # (it mixes sequence/feature; NOT a head transpose). Contiguous row-major
        # reshape -> free view.
        qkv = qkv.reshape(3, b * h, n, d)

        # Flash-style causal SDPA (Pallas).
        out = flash_attention(qkv, causal=is_causal)       # (b*h, n, d)

        # torch's `.contiguous().view(b, n, -1)` raw reshape back.
        out = out.reshape(b * n, h * d)

        # dropout == identity at inference time.
        y = matmul(out, self.w_out_t, out_dtype=x.dtype)   # (b*n, E)
        return y.reshape(b, n, e)


# ---------------- pure-JAX reference (for correctness check) ----------------

def _reference_forward(x, module):
    b, n, e = x.shape
    h, d = module.heads, module.dim_head
    cd = module.compute_dtype
    xc = x.astype(cd).reshape(b * n, e)
    qkv = jnp.einsum("mk,jkh->jmh", xc, module.w_qkv_t,
                     preferred_element_type=jnp.float32).astype(cd)
    q, k, v = (t.reshape(b * h, n, d) for t in qkv)        # same raw reshape
    s = jnp.einsum("bqd,bkd->bqk", q, k, preferred_element_type=jnp.float32)
    mask = jnp.tril(jnp.ones((n, n), dtype=bool))
    s = jnp.where(mask[None], s, -jnp.inf)
    p = jax.nn.softmax(s, axis=-1)
    o = jnp.einsum("bqk,bkd->bqd", p.astype(cd), v,
                   preferred_element_type=jnp.float32).astype(cd)
    o = o.reshape(b * n, h * d)
    y = jnp.dot(o, module.w_out_t, preferred_element_type=jnp.float32)
    return y.reshape(b, n, e).astype(x.dtype)


if __name__ == "__main__":
    key = jax.random.PRNGKey(0)
    kx, kp = jax.random.split(key)

    B, N, E, H = 2, 16, 32, 4
    x = jax.random.normal(kx, (B, N, E), dtype=jnp.float32)

    mhsa = MultiHeadSelfAttentionPallas(embed_dim=E, num_heads=H, key=kp)
    out = jax.block_until_ready(mhsa(x, is_causal=True))

    assert out.shape == (B, N, E), out.shape
    assert bool(jnp.all(jnp.isfinite(out)))

    ref = _reference_forward(x, mhsa)
    # bf16 MXU operands (per perf review): tolerance reflects only bf16 rounding-order
    # differences; structural errors would be orders of magnitude larger.
    err = float(jnp.max(jnp.abs(out - ref)))
    assert bool(jnp.allclose(out, ref, atol=2e-2, rtol=2e-2)), err

    print("KERNEL_OK")
</pallas_src>

<mosaic_0001>
module attributes {stable_mosaic.version = 11 : i64} {
  func.func @_qkv_proj_kernel(%arg0: i32, %arg1: i32, %arg2: memref<32x32xbf16, #tpu.memory_space<vmem>>, %arg3: memref<1x32x32xbf16, #tpu.memory_space<vmem>>, %arg4: memref<1x32x32xbf16, #tpu.memory_space<vmem>>) attributes {dimension_semantics = [#tpu.dimension_semantics<parallel>, #tpu.dimension_semantics<arbitrary>], iteration_bounds = array<i64: 1, 3>, scalar_prefetch = 0 : i64, scratch_operands = 0 : i64, tpu.core_type = #tpu.core_type<tc>, window_params = [{transform_indices = @transform_0, window_bounds = array<i64: 32, 32>}, {transform_indices = @transform_1, window_bounds = array<i64: 1, 32, 32>}, {transform_indices = @transform_2, window_bounds = array<i64: 1, 32, 32>}]} {
    %c0 = arith.constant 0 : index
    %c0_0 = arith.constant 0 : index
    %0 = vector.load %arg2[%c0, %c0_0] : memref<32x32xbf16, #tpu.memory_space<vmem>>, vector<32x32xbf16>
    %c0_1 = arith.constant 0 : index
    %c0_2 = arith.constant 0 : index
    %c0_3 = arith.constant 0 : index
    %1 = vector.load %arg3[%c0_1, %c0_2, %c0_3] : memref<1x32x32xbf16, #tpu.memory_space<vmem>>, vector<1x32x32xbf16>
    %2 = vector.shape_cast %1 : vector<1x32x32xbf16> to vector<32x32xbf16>
    %cst = arith.constant dense<0.000000e+00> : vector<32x32xf32>
    %3 = tpu.matmul %0, %2, %cst {dimension_numbers = #tpu.dot_dimension_numbers<[1], [0], [0], [1], [0, 0, 1, 1], [], []>} : vector<32x32xbf16>, vector<32x32xbf16>, vector<32x32xf32> -> vector<32x32xf32>
    %4 = arith.truncf %3 : vector<32x32xf32> to vector<32x32xbf16>
    %c0_4 = arith.constant 0 : index
    %c0_5 = arith.constant 0 : index
    %c0_6 = arith.constant 0 : index
    %5 = vector.load %arg4[%c0_4, %c0_5, %c0_6] : memref<1x32x32xbf16, #tpu.memory_space<vmem>>, vector<1x32x32xbf16>
    %6 = vector.shape_cast %5 : vector<1x32x32xbf16> to vector<32x32xbf16>
    %7 = vector.shape_cast %4 : vector<32x32xbf16> to vector<1x32x32xbf16>
    tpu.vector_store %arg4[%c0_4, %c0_5, %c0_6], %7 {strides = array<i32>} : memref<1x32x32xbf16, #tpu.memory_space<vmem>>, vector<1x32x32xbf16>,
    return
  }
  func.func @transform_0(%arg0: i32, %arg1: i32) -> (i32, i32) {
    %c0_i32 = arith.constant 0 : i32
    %c0_i32_0 = arith.constant 0 : i32
    return %arg0, %c0_i32 : i32, i32
  }
  func.func @transform_1(%arg0: i32, %arg1: i32) -> (i32, i32, i32) {
    %c0_i32 = arith.constant 0 : i32
    %c0_i32_0 = arith.constant 0 : i32
    %c0_i32_1 = arith.constant 0 : i32
    return %arg1, %c0_i32, %c0_i32_0 : i32, i32, i32
  }
  func.func @transform_2(%arg0: i32, %arg1: i32) -> (i32, i32, i32) {
    %c0_i32 = arith.constant 0 : i32
    %c0_i32_0 = arith.constant 0 : i32
    return %arg1, %arg0, %c0_i32 : i32, i32, i32
  }
}

</mosaic_0001>

<bundles_post_ra>
// kernel: tpu_custom_call.1
= control target key start
LH: loop header
LB: loop body
LE: loop exit
PB: predicated region body
PF: predicated region fallthrough
CT: control target
= control target key end

     0   :  { %7 = vsyncpa [#allocation3], 0  ;;  %s900_s0 = inlined_call_operand.hbm [shape: bf16[32,32], index: 0, kind: input, shape index: {}]   ;;  %s901_s1 = inlined_call_operand.hbm [shape: bf16[3,32,32], index: 1, kind: input, shape index: {}]   ;;  %s902_s2 = inlined_call_operand.hbm [shape: bf16[3,32,32], index: 2, kind: output, shape index: {}]  }
   0x1   :  { %8 = vsyncpa [#allocation6], 0 }
   0x2   :  { %10 = vsyncpa [#allocation6 + $0x1], 0 }
   0x3   :  { %11 = vsyncpa [#allocation4], 0 }
   0x4   :  { %13 = vsyncpa [#allocation4 + $0x1], 0  ;;  %s711_s9 = smov 0   ;;  %s713_s10 = smov 0  }
   0x5   :  { %s715_s11 = smov 0   ;;  %s717_s12 = smov 0  }
   0x6   :  { %s719_s13 = smov 0   ;;  %s721_s14 = smov 0  }
   0x7 LB: > { %s423_s15 = sadd.s32 4294967295, %s687_s14   ;;  %s424_s16 = sadd.s32 4294967294, %s687_s14   ;;  %s687_s14 = sphi %s721_s14, %s19_s14   ;;  %s683_s13 = sphi %s719_s13, %s921_s13   ;;  %s679_s12 = sphi %s717_s12, %s920_s12   ;;  %s675_s11 = sphi %s715_s11, %s919_s11   ;;  %s671_s10 = sphi %s713_s10, %s918_s10   ;;  %s667_s9 = sphi %s711_s9, %s917_s9  }
   0x8   : > { %p77_p0 = scmp.ne.s32.totalorder %s671_s10, %s667_s9  ;;  %p745_p1 = scmp.eq.s32.totalorder %s423_s15, 0 }
   0x9   : > { %p749_p2 = scmp.eq.s32.totalorder %s423_s15, 2  ;;  %p109_p3 = scmp.eq.s32.totalorder %s424_s16, 2 }
   0xa   : > { %p755_p4 = por %p745_p1, %p77_p0  ;;  %p425_p5 = scmp.ge.s32.totalorder %s687_s14, 1 }
   0xb   : > { %p760_p6 = por %p109_p3, %p77_p0  ;;  %p116_p7 = scmp.lt.s32.totalorder %s687_s14, 4 }
   0xc   : > { %s689_s22 = smov [#allocation2]   ;;  %s28_s25 = sadd.s32 1, %s683_s13 }
   0xd   : > { %s908_s20 = scalar_select %p760_p6, 1, 0 }
   0xe   : > { %p765_p8 = pnand %p425_p5, %p116_p7  ;;  %s131_s23 = sshll.u32 %s689_s22, 4  ;;  %s132_s23 = int_to_ptr.vmem [resolvable:$true] %s131_s23 }
   0xf   : > { %s560_s26 = scalar_lea.vmem %s132_s23, 256  ;;  %p568_p3 = scmp.lt.s32.totalorder %s132_s23, %s132_s23 }
  0x10   : > { %p476_p9 = pneg %p765_p8  ;;  %p561_p12 = scmp.ne.s32.totalorder %s132_s23, %s560_s26 }
  0x11   : > { %p569_p5 = scmp.lt.s32.totalorder %s560_s26, %s560_s26 }
  0x12   : > { %p773_p10 = pnand %p476_p9, %p745_p1 }
  0x13   : > { %p570_p7 = por %p569_p5, %p568_p3 }
  0x14   : > { %p551_p11 = pneg %p773_p10 }
  0x16   : > { %p563_p13 = pnand %p561_p12, %p551_p11 }
  0x18   : > { %p564_p0 = pneg %p563_p13 }
  0x1a   : > { %p571_p6 = pnand %p570_p7, %p564_p0 }
  0x1c   : > { %574 = shalt.err (!%p571_p6)
}
  0x1d   : > { %s903_s27 = smov 64   ;;  %s691_s28 = smov 4  }
  0x1e   : > { %479 = dma.hbm_to_vmem [thread:$0]  (!%p773_p10), %s900_s0, 256, %s132_s23, [#allocation3], %s903_s27, %s903_s27, %s691_s28  }
  0x1f   : > { %p29_p6 = scmp.ge.s32.totalorder %s28_s25, 3  ;;  %s64_s3 = sadd.s32 1, %s675_s11 }
  0x20   : > { %p71_p9 = scmp.ne.s32.totalorder %s675_s11, %s671_s10  ;;  %p72_p11 = scmp.eq.s32.totalorder %s687_s14, 0 }
  0x21   : > { %s923_s25 = smov (%p29_p6, %s28_s25), 0  ;;  %p489_p0 = scmp.lt.s32.totalorder %s687_s14, 3 }
  0x22   : > { %p794_p12 = por %p72_p11, %p71_p9  ;;  %p800_p13 = por %p749_p2, %p71_p9 }
  0x23   : > { %s61_s6 = ssub.s32 %s683_s13, %s923_s25  ;;  %s145_s7 = sand.u32 1, %s675_s11  }
  0x24   : > { %s912_s5 = scalar_select %p800_p13, 1, 0 }
  0x25   : > { %p62_p10 = scmp.eq.s32.totalorder %s61_s6, 0  ;;  %s428_s8 = sshll.u32 %s145_s7, 4 }
  0x26   : > { %s450_s16 = sshll.u32 %s683_s13, 8  ;;  %s149_s26 = scalar_lea.vmem [#allocation5], %s428_s8 }
  0x27   : > { %s809_s15 = scalar_select %p62_p10, %s675_s11, %s64_s3  }
  0x28   : > { %s155_s24 = scalar_lea.hbm %s901_s1, %s450_s16  ;;  %s156_s29 = sshll.u32 %s149_s26, 4  ;;  %s157_s29 = int_to_ptr.vmem [resolvable:$true] %s156_s29 }
  0x29   : > { %p817_p2 = pnand %p489_p0, %p794_p12  ;;  %s146_s30 = scalar_lea.sflag [#allocation6], %s145_s7 }
  0x2a   : > { %s588_s6 = scalar_lea.vmem %s157_s29, 256  ;;  %s692_s3 = smov [#allocation5]  }
  0x2b   : > { %p577_p3 = pneg %p817_p2  ;;  %p589_p5 = scmp.ne.s32.totalorder %s157_s29, %s588_s6 }
  0x2c   : > { %s593_s27 = sshll.u32 %s692_s3, 4  ;;  %s594_s27 = int_to_ptr.vmem [resolvable:$false] %s593_s27 }
  0x2d   : > { %p591_p7 = pnand %p589_p5, %p577_p3  ;;  %s595_s16 = scalar_lea.vmem %s594_s27, 512 }
  0x2e   : > { %p596_p9 = scmp.lt.s32.totalorder %s157_s29, %s594_s27  ;;  %p597_p11 = scmp.lt.s32.totalorder %s595_s16, %s588_s6 }
  0x2f   : > { %p592_p6 = pneg %p591_p7 }
  0x30   : > { %p598_p10 = por %p597_p11, %p596_p9 }
  0x32   : > { %p599_p13 = pnand %p598_p10, %p592_p6 }
  0x34   : > { %602 = shalt.err (!%p599_p13)
}
  0x35   : > { %s914_s4 = smov 64   ;;  %168 = sbr.rel (%p765_p8) target bundleno = 287 (0x11f), region = 28 }
  0x36   : > { %483 = dma.hbm_to_vmem [thread:$0]  (!%p817_p2), %s155_s24, 256, %s157_s29, %s146_s30, %s914_s4, %s914_s4, %s691_s28  }
  0x3a   : > { %654 = dma.done.wait (%p745_p1), [#allocation3], 256  }
  0x3b   : > { %656 = vsyncadd (%p745_p1), [#allocation3], 4294967040  ;;  %s835_s27 = sand.u32 1, %s671_s10  }
  0x3c   : > { %s433_s7 = sshll.u32 %s835_s27, 4  ;;  %s175_s8 = scalar_lea.sflag [#allocation6], %s835_s27 }
  0x3d   : > { %s178_s22 = scalar_lea.vmem [#allocation5], %s433_s7 }
  0x3e   : > { %658 = dma.done.wait (%p755_p4), %s175_s8, 256  }
  0x3f   : > { %660 = vsyncadd (%p755_p4), %s175_s8, 4294967040  ;;  %v545_v0 = vld [vmem:[%s178_s22 + $0x8] sm:$0xff]   ;;  %v546_v1 = vld [vmem:[%s178_s22] sm:$0xff]   ;;  %vm232_vm0 = vcmask 261120   ;;  %vm304_vm1 = vcmask 257024   ;;  %s198_s17 = scalar_lea.vmem [#allocation7], %s433_s7 }
  0x40   : > { %460 = vmatprep.subr.bf16.mxu0 %v545_v0  ;;  %v547_v2 = vld [vmem:[#allocation2] sm:$0xff]   ;;  %v548_v3 = vld [vmem:[#allocation2 + $0x8] sm:$0xff]   ;;  %s325_s21 = sshll.u32 %s198_s17, 4  ;;  %s455_s19 = sshll.u32 %s679_s12, 8  ;;  %s845_s21 = int_to_ptr.vmem [resolvable:$true] %s325_s21 }
  0x41   : > { %461 = vmatpush3.bf16.msra.mxu0 %v545_v0  ;;  %464 = vmatprep.mubr.msk.bf16.mxu0 %vm232_vm0, %v547_v2  ;;  %s851_s24 = scalar_lea.hbm %s902_s2, %s455_s19  ;;  %s310_s12 = scalar_lea.sflag [#allocation4], %s835_s27 }
  0x42   : > { %462 = vmatprep.subr.bf16.mxu0 %v546_v1  ;;  %s603_s26 = scalar_lea.vmem %s845_s21, 256  ;;  %p915_p4 = scmp.ne.s32.totalorder %s912_s5, 0 }
  0x43   : > { %p604_p1 = scmp.ne.s32.totalorder %s845_s21, %s603_s26  ;;  %s693_s29 = smov [#allocation7]  }
  0x44   : > { %s607_s18 = sshll.u32 %s693_s29, 4  ;;  %s608_s18 = int_to_ptr.vmem [resolvable:$false] %s607_s18 }
  0x45   : > { %463 = vmatpush3.bf16.msra.mxu0 %v546_v1  ;;  %p605_p8 = pnand %p604_p1, %p915_p4  ;;  %s609_s30 = scalar_lea.vmem %s608_s18, 512 }
  0x46   : > { %p610_p13 = scmp.lt.s32.totalorder %s845_s21, %s608_s18  ;;  %p611_p0 = scmp.lt.s32.totalorder %s609_s30, %s603_s26 }
  0x47   : > { %p606_p12 = pneg %p605_p8 }
  0x48   : > { %465 = vmatmul.mubr.msk.bf16.vlgmr.msra.gmra.mxu0 %vm232_vm0, %v548_v3  ;;  %p612_p2 = por %p611_p0, %p610_p13 }
  0x4a   : > { %p613_p3 = pnand %p612_p2, %p606_p12 }
 0x108   : > { %v466_v4 = vpop.f32.mrf.mxu0 }
 0x109   : > { %v453_v5 = vpack.c.bf16 %v466_v4, %v466_v4 }
 0x10a   : > { %v273_v6 = vpop.f32.mrf.mxu0 }
 0x10b   : > { %307 = vst.msk [vmem:[%s198_s17 + $0x8] sm:$0xf] %vm304_vm1, %v453_v5  ;;  %v451_v7 = vpack.c.bf16 %v273_v6, %v273_v6 }
 0x10c   : > { %v467_v8 = vpop.f32.mrf.mxu0 }
 0x10d   : > { %305 = vst.msk [vmem:[%s198_s17] sm:$0xf] %vm304_vm1, %v451_v7  ;;  %v454_v9 = vpack.c.bf16 %v467_v8, %v467_v8 }
 0x10e   : > { %v276_v10 = vpop.f32.mrf.mxu0 }
 0x10f   : > { %308 = vst.msk [vmem:[%s198_s17 + $0xc] sm:$0xf] %vm304_vm1, %v454_v9  ;;  %v452_v11 = vpack.c.bf16 %v276_v10, %v276_v10 }
 0x111   : > { %306 = vst.msk [vmem:[%s198_s17 + $0x4] sm:$0xf] %vm304_vm1, %v452_v11 }
 0x112   : > { %616 = shalt.err (!%p613_p3)
}
 0x113   : > { %s617_s6 = scalar_lea.hbm %s851_s24, 256  ;;  %s621_s4 = scalar_lea.hbm %s902_s2, 768 }
 0x114   : > { %p618_p5 = scmp.ne.s32.totalorder %s851_s24, %s617_s6  ;;  %p622_p9 = scmp.lt.s32.totalorder %s851_s24, %s902_s2 }
 0x115   : > { %p623_p11 = scmp.lt.s32.totalorder %s621_s4, %s617_s6 }
 0x116   : > { %p619_p7 = pnand %p618_p5, %p915_p4 }
 0x117   : > { %p624_p10 = por %p623_p11, %p622_p9 }
 0x118   : > { %p620_p6 = pneg %p619_p7 }
 0x11a   : > { %p625_p1 = pnand %p624_p10, %p620_p6 }
 0x11c   : > { %628 = shalt.err (!%p625_p1)
}
 0x11d   : > { %s694_s22 = smov 64   ;;  %s695_s17 = smov 4  }
 0x11e   : > { %474 = dma.vmem_to_hbm [thread:$0]  (%p915_p4), %s845_s21, 256, %s851_s24, %s310_s12, %s694_s22, %s694_s22, %s695_s17  }
 0x11f PF: > { %p491_p8 = scmp.ge.s32.totalorder %s687_s14, 2  ;;  %s340_s19 = sand.u32 1, %s667_s9  }
 0x120   : > { %p916_p12 = scmp.ne.s32.totalorder %s908_s20, 0  ;;  %s341_s28 = scalar_lea.sflag [#allocation4], %s340_s19 }
 0x122   : > { %p485_p13 = pnand %p491_p8, %p916_p12 }
 0x124   : > { %p486_p0 = pneg %p485_p13 }
 0x126   : > { %662 = dma.done.wait (%p486_p0), %s341_s28, 256  }
 0x127   : > { %664 = vsyncadd (%p486_p0), %s341_s28, 4294967040  ;;  %s19_s14 = sadd.s32 1, %s687_s14   ;;  %s917_s9 = smov %s671_s10 }
 0x128   : > { %p16_p2 = scmp.ge.s32.totalorder %s19_s14, 5   ;;  %s918_s10 = smov %s675_s11 }
 0x129   : > { %s919_s11 = smov %s809_s15  ;;  %s920_s12 = smov %s683_s13 }
 0x12a   : > { %s921_s13 = smov %s923_s25  ;;  %18 = sbr.rel (!%p16_p2) target bundleno = 7 (0x7), region = 79 }
 0x12f   :  { %346 = vsyncpa [#allocation3], 1 }
 0x130   :  { %348 = vsyncpa [#allocation3 + $0x1], 1 }
 0x131   :  { %349 = vsyncpa [#allocation6], 1 }
 0x132   :  { %351 = vsyncpa [#allocation6 + $0x1], 1 }
 0x133   :  { %352 = vsyncpa [#allocation4], 1 }
 0x134   :  { %354 = vsyncpa [#allocation4 + $0x1], 1 }

</bundles_post_ra>
